<compile_context>
chip_gen: v5e
topology: v5e:2x2
jax: 0.10.0
libtpu: 0.0.40
codegen_flags: <defaults>
</compile_context>

<pallas_src>
import jax
import jax.numpy as jnp
from jax.experimental import pallas as pl
from jax.experimental.pallas import tpu as pltpu


def autoencoder_kernel(x_ref,
                       w1_ref, b1_ref,
                       w2_ref, b2_ref,
                       w3_ref, b3_ref,
                       w4_ref, b4_ref,
                       out_ref):
    # Encoder: Linear(D, H) + ReLU   (bf16 operands, f32 accumulation on MXU)
    h1 = jnp.dot(x_ref[...], w1_ref[...], preferred_element_type=jnp.float32)
    h1 = jnp.maximum(h1 + b1_ref[...], 0.0)

    # Encoder: Linear(H, L) -> latent code (L lane-padded; padded cols are 0)
    z = jnp.dot(h1.astype(w2_ref.dtype), w2_ref[...],
                preferred_element_type=jnp.float32) + b2_ref[...]

    # Decoder: Linear(L, H) + ReLU (padded latent rows of w3 are 0 -> no-op)
    h2 = jnp.dot(z.astype(w3_ref.dtype), w3_ref[...],
                 preferred_element_type=jnp.float32)
    h2 = jnp.maximum(h2 + b3_ref[...], 0.0)

    # Decoder: Linear(H, D) -> reconstruction
    y = jnp.dot(h2.astype(w4_ref.dtype), w4_ref[...],
                preferred_element_type=jnp.float32) + b4_ref[...]

    out_ref[...] = y.astype(out_ref.dtype)


def _build_call(Bp, D, Hp, Lp, tile_b, out_dtype, single_buffer_weights):
    grid = (Bp // tile_b,)

    def const_spec(shape):
        # Grid-invariant block: same data at every grid step.
        if single_buffer_weights:
            return pl.BlockSpec(shape, lambda i: (0,) * len(shape),
                                pipeline_mode=pl.Buffered(1))
        return pl.BlockSpec(shape, lambda i: (0,) * len(shape))

    return pl.pallas_call(
        autoencoder_kernel,
        out_shape=jax.ShapeDtypeStruct((Bp, D), out_dtype),
        grid_spec=pltpu.PrefetchScalarGridSpec(
            num_scalar_prefetch=0,
            grid=grid,
            in_specs=[
                pl.BlockSpec((tile_b, D), lambda i: (i, 0)),    # x batch tile
                const_spec((D, Hp)), const_spec((1, Hp)),       # enc Linear 1
                const_spec((Hp, Lp)), const_spec((1, Lp)),      # enc Linear 2
                const_spec((Lp, Hp)), const_spec((1, Hp)),      # dec Linear 1
                const_spec((Hp, D)), const_spec((1, D)),        # dec Linear 2
            ],
            out_specs=pl.BlockSpec((tile_b, D), lambda i: (i, 0)),
        ),
        # Batch tiles are independent -> allow megacore split (v7x: 2 TCs).
        compiler_params=pltpu.CompilerParams(
            dimension_semantics=("parallel",),
        ),
    )


def _round_up(n, m):
    return ((n + m - 1) // m) * m


def pbmc_autoencoder(x, params, *, tile_b=None, compute_dtype=jnp.bfloat16):
    """x: (B, D). params: dict of f32 weights/biases. Returns (B, D) in x.dtype."""
    B, D = x.shape
    w1, b1 = params["w1"], params["b1"]
    w2, b2 = params["w2"], params["b2"]
    w3, b3 = params["w3"], params["b3"]
    w4, b4 = params["w4"], params["b4"]
    H = w1.shape[1]
    L = w2.shape[1]

    # One big batch tile: whole batch (rounded up to a multiple of 8 sublanes)
    # for small B, otherwise 256-row MXU-filling tiles.
    if tile_b is None:
        tile_b = 256 if B > 256 else max(8, _round_up(B, 8))
    assert tile_b % 8 == 0, "tile_b must be a multiple of 8"

    # Pad batch to a multiple of tile_b with zero rows (sliced off afterwards).
    Bp = _round_up(B, tile_b)
    xp = x if Bp == B else jnp.pad(x, ((0, Bp - B), (0, 0)))

    # Zero-pad hidden / latent dims to lane-dense multiples of 128.  Exact:
    # padded weight columns/rows and bias entries are zero and ReLU(0)=0, so
    # the padded units contribute nothing downstream.
    Hp = _round_up(H, 128)
    Lp = _round_up(L, 128)
    if Hp != H:
        w1 = jnp.pad(w1, ((0, 0), (0, Hp - H)))
        b1 = jnp.pad(b1, ((0, 0), (0, Hp - H)))
        w2 = jnp.pad(w2, ((0, Hp - H), (0, 0)))
        w3 = jnp.pad(w3, ((0, 0), (0, Hp - H)))
        b3 = jnp.pad(b3, ((0, 0), (0, Hp - H)))
        w4 = jnp.pad(w4, ((0, Hp - H), (0, 0)))
    if Lp != L:
        w2 = jnp.pad(w2, ((0, 0), (0, Lp - L)))
        b2 = jnp.pad(b2, ((0, 0), (0, Lp - L)))
        w3 = jnp.pad(w3, ((0, Lp - L), (0, 0)))

    # bf16 matmul operands (f32 accumulation inside the kernel); biases stay
    # f32 and the bias-add / ReLU run in f32.
    xc = xp.astype(compute_dtype)
    w1c, w2c, w3c, w4c = (w.astype(compute_dtype) for w in (w1, w2, w3, w4))
    args = (xc, w1c, b1, w2c, b2, w3c, b3, w4c, b4)

    try:
        call = _build_call(Bp, D, Hp, Lp, tile_b, x.dtype,
                           single_buffer_weights=True)
        out = call(*args)
    except Exception:
        # pl.Buffered pipeline_mode not supported by this jax version: fall
        # back to default double-buffered weight blocks (harmless at these
        # sizes since the blocks are tiny and grid-invariant).
        call = _build_call(Bp, D, Hp, Lp, tile_b, x.dtype,
                           single_buffer_weights=False)
        out = call(*args)

    return out if Bp == B else out[:B]


def init_params(key, D, H, L):
    """Deterministic PyTorch-Linear-style init (uniform +/- 1/sqrt(fan_in))."""
    ks = jax.random.split(key, 8)

    def linear(kw, kb, fan_in, fan_out):
        bound = 1.0 / jnp.sqrt(jnp.float32(fan_in))
        w = jax.random.uniform(kw, (fan_in, fan_out), jnp.float32, -bound, bound)
        b = jax.random.uniform(kb, (1, fan_out), jnp.float32, -bound, bound)
        return w, b

    w1, b1 = linear(ks[0], ks[1], D, H)
    w2, b2 = linear(ks[2], ks[3], H, L)
    w3, b3 = linear(ks[4], ks[5], L, H)
    w4, b4 = linear(ks[6], ks[7], H, D)
    return dict(w1=w1, b1=b1, w2=w2, b2=b2, w3=w3, b3=b3, w4=w4, b4=b4)


def reference_forward(x, p):
    h1 = jnp.maximum(x @ p["w1"] + p["b1"], 0.0)
    z = h1 @ p["w2"] + p["b2"]
    h2 = jnp.maximum(z @ p["w3"] + p["b3"], 0.0)
    return h2 @ p["w4"] + p["b4"]


def reference_forward_bf16(x, p):
    bf = jnp.bfloat16
    h1 = jnp.maximum(
        jnp.dot(x.astype(bf), p["w1"].astype(bf),
                preferred_element_type=jnp.float32) + p["b1"], 0.0)
    z = jnp.dot(h1.astype(bf), p["w2"].astype(bf),
                preferred_element_type=jnp.float32) + p["b2"]
    h2 = jnp.maximum(
        jnp.dot(z.astype(bf), p["w3"].astype(bf),
                preferred_element_type=jnp.float32) + p["b3"], 0.0)
    return jnp.dot(h2.astype(bf), p["w4"].astype(bf),
                   preferred_element_type=jnp.float32) + p["b4"]


if __name__ == "__main__":
    key = jax.random.PRNGKey(0)
    k_x, k_p, k_x2, k_x3 = jax.random.split(key, 4)

    # Small PBMC-like shapes: batch, genes (input dim), hidden, latent.
    B, D, H, L = 16, 256, 128, 32
    x = jax.random.normal(k_x, (B, D), dtype=jnp.float32)
    params = init_params(k_p, D, H, L)

    # Single-step case: whole batch in one tile (grid has one step).
    out = jax.block_until_ready(pbmc_autoencoder(x, params))
    assert out.shape == (B, D)
    assert jnp.allclose(out, reference_forward(x, params),
                        atol=5e-2, rtol=5e-2), "mismatch vs f32 reference"
    assert jnp.allclose(out, reference_forward_bf16(x, params),
                        atol=5e-3, rtol=5e-3), "mismatch vs bf16 reference"

    # Multi-step grid case: two 128-row batch tiles, parallel over the grid.
    B2 = 256
    x2 = jax.random.normal(k_x2, (B2, D), dtype=jnp.float32)
    out2 = jax.block_until_ready(pbmc_autoencoder(x2, params, tile_b=128))
    assert out2.shape == (B2, D)
    assert jnp.allclose(out2, reference_forward(x2, params),
                        atol=5e-2, rtol=5e-2), "mismatch vs f32 reference (tiled)"

    # Ragged-batch case: exercises the batch zero-padding path.
    B3 = 20
    x3 = jax.random.normal(k_x3, (B3, D), dtype=jnp.float32)
    out3 = jax.block_until_ready(pbmc_autoencoder(x3, params))
    assert out3.shape == (B3, D)
    assert jnp.allclose(out3, reference_forward(x3, params),
                        atol=5e-2, rtol=5e-2), "mismatch vs f32 reference (padded)"

    print("KERNEL_OK")
</pallas_src>

<mosaic_0001>
module attributes {stable_mosaic.version = 11 : i64} {
  func.func @autoencoder_kernel(%arg0: i32, %arg1: memref<16x256xbf16, #tpu.memory_space<vmem>>, %arg2: memref<256x128xbf16, #tpu.memory_space<vmem>>, %arg3: memref<1x128xf32, #tpu.memory_space<vmem>>, %arg4: memref<128x128xbf16, #tpu.memory_space<vmem>>, %arg5: memref<1x128xf32, #tpu.memory_space<vmem>>, %arg6: memref<128x128xbf16, #tpu.memory_space<vmem>>, %arg7: memref<1x128xf32, #tpu.memory_space<vmem>>, %arg8: memref<128x256xbf16, #tpu.memory_space<vmem>>, %arg9: memref<1x256xf32, #tpu.memory_space<vmem>>, %arg10: memref<16x256xf32, #tpu.memory_space<vmem>>) attributes {dimension_semantics = [#tpu.dimension_semantics<parallel>], iteration_bounds = array<i64: 1>, scalar_prefetch = 0 : i64, scratch_operands = 0 : i64, tpu.core_type = #tpu.core_type<tc>, window_params = [{transform_indices = @transform_0, window_bounds = array<i64: 16, 256>}, {pipeline_mode = #tpu.pipeline_mode<synchronous>, transform_indices = @transform_1, window_bounds = array<i64: 256, 128>}, {pipeline_mode = #tpu.pipeline_mode<synchronous>, transform_indices = @transform_2, window_bounds = array<i64: 1, 128>}, {pipeline_mode = #tpu.pipeline_mode<synchronous>, transform_indices = @transform_3, window_bounds = array<i64: 128, 128>}, {pipeline_mode = #tpu.pipeline_mode<synchronous>, transform_indices = @transform_4, window_bounds = array<i64: 1, 128>}, {pipeline_mode = #tpu.pipeline_mode<synchronous>, transform_indices = @transform_5, window_bounds = array<i64: 128, 128>}, {pipeline_mode = #tpu.pipeline_mode<synchronous>, transform_indices = @transform_6, window_bounds = array<i64: 1, 128>}, {pipeline_mode = #tpu.pipeline_mode<synchronous>, transform_indices = @transform_7, window_bounds = array<i64: 128, 256>}, {pipeline_mode = #tpu.pipeline_mode<synchronous>, transform_indices = @transform_8, window_bounds = array<i64: 1, 256>}, {transform_indices = @transform_9, window_bounds = array<i64: 16, 256>}]} {
    %c0 = arith.constant 0 : index
    %c0_0 = arith.constant 0 : index
    %0 = vector.load %arg1[%c0, %c0_0] : memref<16x256xbf16, #tpu.memory_space<vmem>>, vector<16x256xbf16>
    %c0_1 = arith.constant 0 : index
    %c0_2 = arith.constant 0 : index
    %1 = vector.load %arg2[%c0_1, %c0_2] : memref<256x128xbf16, #tpu.memory_space<vmem>>, vector<256x128xbf16>
    %cst = arith.constant dense<0.000000e+00> : vector<16x128xf32>
    %2 = tpu.matmul %0, %1, %cst {dimension_numbers = #tpu.dot_dimension_numbers<[1], [0], [0], [1], [0, 0, 1, 1], [], []>} : vector<16x256xbf16>, vector<256x128xbf16>, vector<16x128xf32> -> vector<16x128xf32>
    %c0_3 = arith.constant 0 : index
    %c0_4 = arith.constant 0 : index
    %3 = vector.load %arg3[%c0_3, %c0_4] : memref<1x128xf32, #tpu.memory_space<vmem>>, vector<1x128xf32>
    %4 = vector.broadcast %3 : vector<1x128xf32> to vector<16x128xf32>
    %5 = arith.addf %2, %4 : vector<16x128xf32>
    %cst_5 = arith.constant 0.000000e+00 : f32
    %6 = vector.broadcast %cst_5 : f32 to vector<16x128xf32>
    %7 = arith.maximumf %5, %6 : vector<16x128xf32>
    %8 = arith.truncf %7 : vector<16x128xf32> to vector<16x128xbf16>
    %c0_6 = arith.constant 0 : index
    %c0_7 = arith.constant 0 : index
    %9 = vector.load %arg4[%c0_6, %c0_7] : memref<128x128xbf16, #tpu.memory_space<vmem>>, vector<128x128xbf16>
    %cst_8 = arith.constant dense<0.000000e+00> : vector<16x128xf32>
    %10 = tpu.matmul %8, %9, %cst_8 {dimension_numbers = #tpu.dot_dimension_numbers<[1], [0], [0], [1], [0, 0, 1, 1], [], []>} : vector<16x128xbf16>, vector<128x128xbf16>, vector<16x128xf32> -> vector<16x128xf32>
    %c0_9 = arith.constant 0 : index
    %c0_10 = arith.constant 0 : index
    %11 = vector.load %arg5[%c0_9, %c0_10] : memref<1x128xf32, #tpu.memory_space<vmem>>, vector<1x128xf32>
    %12 = vector.broadcast %11 : vector<1x128xf32> to vector<16x128xf32>
    %13 = arith.addf %10, %12 : vector<16x128xf32>
    %14 = arith.truncf %13 : vector<16x128xf32> to vector<16x128xbf16>
    %c0_11 = arith.constant 0 : index
    %c0_12 = arith.constant 0 : index
    %15 = vector.load %arg6[%c0_11, %c0_12] : memref<128x128xbf16, #tpu.memory_space<vmem>>, vector<128x128xbf16>
    %cst_13 = arith.constant dense<0.000000e+00> : vector<16x128xf32>
    %16 = tpu.matmul %14, %15, %cst_13 {dimension_numbers = #tpu.dot_dimension_numbers<[1], [0], [0], [1], [0, 0, 1, 1], [], []>} : vector<16x128xbf16>, vector<128x128xbf16>, vector<16x128xf32> -> vector<16x128xf32>
    %c0_14 = arith.constant 0 : index
    %c0_15 = arith.constant 0 : index
    %17 = vector.load %arg7[%c0_14, %c0_15] : memref<1x128xf32, #tpu.memory_space<vmem>>, vector<1x128xf32>
    %18 = vector.broadcast %17 : vector<1x128xf32> to vector<16x128xf32>
    %19 = arith.addf %16, %18 : vector<16x128xf32>
    %cst_16 = arith.constant 0.000000e+00 : f32
    %20 = vector.broadcast %cst_16 : f32 to vector<16x128xf32>
    %21 = arith.maximumf %19, %20 : vector<16x128xf32>
    %22 = arith.truncf %21 : vector<16x128xf32> to vector<16x128xbf16>
    %c0_17 = arith.constant 0 : index
    %c0_18 = arith.constant 0 : index
    %23 = vector.load %arg8[%c0_17, %c0_18] : memref<128x256xbf16, #tpu.memory_space<vmem>>, vector<128x256xbf16>
    %cst_19 = arith.constant dense<0.000000e+00> : vector<16x256xf32>
    %24 = tpu.matmul %22, %23, %cst_19 {dimension_numbers = #tpu.dot_dimension_numbers<[1], [0], [0], [1], [0, 0, 1, 1], [], []>} : vector<16x128xbf16>, vector<128x256xbf16>, vector<16x256xf32> -> vector<16x256xf32>
    %c0_20 = arith.constant 0 : index
    %c0_21 = arith.constant 0 : index
    %25 = vector.load %arg9[%c0_20, %c0_21] : memref<1x256xf32, #tpu.memory_space<vmem>>, vector<1x256xf32>
    %26 = vector.broadcast %25 : vector<1x256xf32> to vector<16x256xf32>
    %27 = arith.addf %24, %26 : vector<16x256xf32>
    %c0_22 = arith.constant 0 : index
    %c0_23 = arith.constant 0 : index
    %28 = vector.load %arg10[%c0_22, %c0_23] : memref<16x256xf32, #tpu.memory_space<vmem>>, vector<16x256xf32>
    tpu.vector_store %arg10[%c0_22, %c0_23], %27 {strides = array<i32>} : memref<16x256xf32, #tpu.memory_space<vmem>>, vector<16x256xf32>,
    return
  }
  func.func @transform_0(%arg0: i32) -> (i32, i32) {
    %c0_i32 = arith.constant 0 : i32
    %c0_i32_0 = arith.constant 0 : i32
    return %arg0, %c0_i32 : i32, i32
  }
  func.func @transform_1(%arg0: i32) -> (i32, i32) {
    %c0_i32 = arith.constant 0 : i32
    %c0_i32_0 = arith.constant 0 : i32
    %c0_i32_1 = arith.constant 0 : i32
    return %c0_i32, %c0_i32_0 : i32, i32
  }
  func.func @transform_2(%arg0: i32) -> (i32, i32) {
    %c0_i32 = arith.constant 0 : i32
    %c0_i32_0 = arith.constant 0 : i32
    %c0_i32_1 = arith.constant 0 : i32
    return %c0_i32, %c0_i32_0 : i32, i32
  }
  func.func @transform_3(%arg0: i32) -> (i32, i32) {
    %c0_i32 = arith.constant 0 : i32
    %c0_i32_0 = arith.constant 0 : i32
    %c0_i32_1 = arith.constant 0 : i32
    return %c0_i32, %c0_i32_0 : i32, i32
  }
  func.func @transform_4(%arg0: i32) -> (i32, i32) {
    %c0_i32 = arith.constant 0 : i32
    %c0_i32_0 = arith.constant 0 : i32
    %c0_i32_1 = arith.constant 0 : i32
    return %c0_i32, %c0_i32_0 : i32, i32
  }
  func.func @transform_5(%arg0: i32) -> (i32, i32) {
    %c0_i32 = arith.constant 0 : i32
    %c0_i32_0 = arith.constant 0 : i32
    %c0_i32_1 = arith.constant 0 : i32
    return %c0_i32, %c0_i32_0 : i32, i32
  }
  func.func @transform_6(%arg0: i32) -> (i32, i32) {
    %c0_i32 = arith.constant 0 : i32
    %c0_i32_0 = arith.constant 0 : i32
    %c0_i32_1 = arith.constant 0 : i32
    return %c0_i32, %c0_i32_0 : i32, i32
  }
  func.func @transform_7(%arg0: i32) -> (i32, i32) {
    %c0_i32 = arith.constant 0 : i32
    %c0_i32_0 = arith.constant 0 : i32
    %c0_i32_1 = arith.constant 0 : i32
    return %c0_i32, %c0_i32_0 : i32, i32
  }
  func.func @transform_8(%arg0: i32) -> (i32, i32) {
    %c0_i32 = arith.constant 0 : i32
    %c0_i32_0 = arith.constant 0 : i32
    %c0_i32_1 = arith.constant 0 : i32
    return %c0_i32, %c0_i32_0 : i32, i32
  }
  func.func @transform_9(%arg0: i32) -> (i32, i32) {
    %c0_i32 = arith.constant 0 : i32
    %c0_i32_0 = arith.constant 0 : i32
    return %arg0, %c0_i32 : i32, i32
  }
}

module attributes {stable_mosaic.version = 11 : i64} {
  func.func @autoencoder_kernel(%arg0: i32, %arg1: memref<16x256xbf16, #tpu.memory_space<vmem>>, %arg2: memref<256x128xbf16, #tpu.memory_space<vmem>>, %arg3: memref<1x128xf32, #tpu.memory_space<vmem>>, %arg4: memref<128x128xbf16, #tpu.memory_space<vmem>>, %arg5: memref<1x128xf32, #tpu.memory_space<vmem>>, %arg6: memref<128x128xbf16, #tpu.memory_space<vmem>>, %arg7: memref<1x128xf32, #tpu.memory_space<vmem>>, %arg8: memref<128x256xbf16, #tpu.memory_space<vmem>>, %arg9: memref<1x256xf32, #tpu.memory_space<vmem>>, %arg10: memref<16x256xf32, #tpu.memory_space<vmem>>) attributes {dimension_semantics = [#tpu.dimension_semantics<parallel>], iteration_bounds = array<i64: 1>, scalar_prefetch = 0 : i64, scratch_operands = 0 : i64, tpu.core_type = #tpu.core_type<tc>, window_params = [{transform_indices = @transform_0, window_bounds = array<i64: 16, 256>}, {pipeline_mode = #tpu.pipeline_mode<synchronous>, transform_indices = @transform_1, window_bounds = array<i64: 256, 128>}, {pipeline_mode = #tpu.pipeline_mode<synchronous>, transform_indices = @transform_2, window_bounds = array<i64: 1, 128>}, {pipeline_mode = #tpu.pipeline_mode<synchronous>, transform_indices = @transform_3, window_bounds = array<i64: 128, 128>}, {pipeline_mode = #tpu.pipeline_mode<synchronous>, transform_indices = @transform_4, window_bounds = array<i64: 1, 128>}, {pipeline_mode = #tpu.pipeline_mode<synchronous>, transform_indices = @transform_5, window_bounds = array<i64: 128, 128>}, {pipeline_mode = #tpu.pipeline_mode<synchronous>, transform_indices = @transform_6, window_bounds = array<i64: 1, 128>}, {pipeline_mode = #tpu.pipeline_mode<synchronous>, transform_indices = @transform_7, window_bounds = array<i64: 128, 256>}, {pipeline_mode = #tpu.pipeline_mode<synchronous>, transform_indices = @transform_8, window_bounds = array<i64: 1, 256>}, {transform_indices = @transform_9, window_bounds = array<i64: 16, 256>}]} {
    %c0 = arith.constant 0 : index
    %c0_0 = arith.constant 0 : index
    %0 = vector.load %arg1[%c0, %c0_0] : memref<16x256xbf16, #tpu.memory_space<vmem>>, vector<16x256xbf16>
    %c0_1 = arith.constant 0 : index
    %c0_2 = arith.constant 0 : index
    %1 = vector.load %arg2[%c0_1, %c0_2] : memref<256x128xbf16, #tpu.memory_space<vmem>>, vector<256x128xbf16>
    %cst = arith.constant dense<0.000000e+00> : vector<16x128xf32>
    %2 = tpu.matmul %0, %1, %cst {dimension_numbers = #tpu.dot_dimension_numbers<[1], [0], [0], [1], [0, 0, 1, 1], [], []>} : vector<16x256xbf16>, vector<256x128xbf16>, vector<16x128xf32> -> vector<16x128xf32>
    %c0_3 = arith.constant 0 : index
    %c0_4 = arith.constant 0 : index
    %3 = vector.load %arg3[%c0_3, %c0_4] : memref<1x128xf32, #tpu.memory_space<vmem>>, vector<1x128xf32>
    %4 = vector.broadcast %3 : vector<1x128xf32> to vector<16x128xf32>
    %5 = arith.addf %2, %4 : vector<16x128xf32>
    %cst_5 = arith.constant 0.000000e+00 : f32
    %6 = vector.broadcast %cst_5 : f32 to vector<16x128xf32>
    %7 = arith.maximumf %5, %6 : vector<16x128xf32>
    %8 = arith.truncf %7 : vector<16x128xf32> to vector<16x128xbf16>
    %c0_6 = arith.constant 0 : index
    %c0_7 = arith.constant 0 : index
    %9 = vector.load %arg4[%c0_6, %c0_7] : memref<128x128xbf16, #tpu.memory_space<vmem>>, vector<128x128xbf16>
    %cst_8 = arith.constant dense<0.000000e+00> : vector<16x128xf32>
    %10 = tpu.matmul %8, %9, %cst_8 {dimension_numbers = #tpu.dot_dimension_numbers<[1], [0], [0], [1], [0, 0, 1, 1], [], []>} : vector<16x128xbf16>, vector<128x128xbf16>, vector<16x128xf32> -> vector<16x128xf32>
    %c0_9 = arith.constant 0 : index
    %c0_10 = arith.constant 0 : index
    %11 = vector.load %arg5[%c0_9, %c0_10] : memref<1x128xf32, #tpu.memory_space<vmem>>, vector<1x128xf32>
    %12 = vector.broadcast %11 : vector<1x128xf32> to vector<16x128xf32>
    %13 = arith.addf %10, %12 : vector<16x128xf32>
    %14 = arith.truncf %13 : vector<16x128xf32> to vector<16x128xbf16>
    %c0_11 = arith.constant 0 : index
    %c0_12 = arith.constant 0 : index
    %15 = vector.load %arg6[%c0_11, %c0_12] : memref<128x128xbf16, #tpu.memory_space<vmem>>, vector<128x128xbf16>
    %cst_13 = arith.constant dense<0.000000e+00> : vector<16x128xf32>
    %16 = tpu.matmul %14, %15, %cst_13 {dimension_numbers = #tpu.dot_dimension_numbers<[1], [0], [0], [1], [0, 0, 1, 1], [], []>} : vector<16x128xbf16>, vector<128x128xbf16>, vector<16x128xf32> -> vector<16x128xf32>
    %c0_14 = arith.constant 0 : index
    %c0_15 = arith.constant 0 : index
    %17 = vector.load %arg7[%c0_14, %c0_15] : memref<1x128xf32, #tpu.memory_space<vmem>>, vector<1x128xf32>
    %18 = vector.broadcast %17 : vector<1x128xf32> to vector<16x128xf32>
    %19 = arith.addf %16, %18 : vector<16x128xf32>
    %cst_16 = arith.constant 0.000000e+00 : f32
    %20 = vector.broadcast %cst_16 : f32 to vector<16x128xf32>
    %21 = arith.maximumf %19, %20 : vector<16x128xf32>
    %22 = arith.truncf %21 : vector<16x128xf32> to vector<16x128xbf16>
    %c0_17 = arith.constant 0 : index
    %c0_18 = arith.constant 0 : index
    %23 = vector.load %arg8[%c0_17, %c0_18] : memref<128x256xbf16, #tpu.memory_space<vmem>>, vector<128x256xbf16>
    %cst_19 = arith.constant dense<0.000000e+00> : vector<16x256xf32>
    %24 = tpu.matmul %22, %23, %cst_19 {dimension_numbers = #tpu.dot_dimension_numbers<[1], [0], [0], [1], [0, 0, 1, 1], [], []>} : vector<16x128xbf16>, vector<128x256xbf16>, vector<16x256xf32> -> vector<16x256xf32>
    %c0_20 = arith.constant 0 : index
    %c0_21 = arith.constant 0 : index
    %25 = vector.load %arg9[%c0_20, %c0_21] : memref<1x256xf32, #tpu.memory_space<vmem>>, vector<1x256xf32>
    %26 = vector.broadcast %25 : vector<1x256xf32> to vector<16x256xf32>
    %27 = arith.addf %24, %26 : vector<16x256xf32>
    %c0_22 = arith.constant 0 : index
    %c0_23 = arith.constant 0 : index
    %28 = vector.load %arg10[%c0_22, %c0_23] : memref<16x256xf32, #tpu.memory_space<vmem>>, vector<16x256xf32>
    tpu.vector_store %arg10[%c0_22, %c0_23], %27 {strides = array<i32>} : memref<16x256xf32, #tpu.memory_space<vmem>>, vector<16x256xf32>,
    return
  }
  func.func @transform_0(%arg0: i32) -> (i32, i32) {
    %c0_i32 = arith.constant 0 : i32
    %c0_i32_0 = arith.constant 0 : i32
    return %arg0, %c0_i32 : i32, i32
  }
  func.func @transform_1(%arg0: i32) -> (i32, i32) {
    %c0_i32 = arith.constant 0 : i32
    %c0_i32_0 = arith.constant 0 : i32
    %c0_i32_1 = arith.constant 0 : i32
    return %c0_i32, %c0_i32_0 : i32, i32
  }
  func.func @transform_2(%arg0: i32) -> (i32, i32) {
    %c0_i32 = arith.constant 0 : i32
    %c0_i32_0 = arith.constant 0 : i32
    %c0_i32_1 = arith.constant 0 : i32
    return %c0_i32, %c0_i32_0 : i32, i32
  }
  func.func @transform_3(%arg0: i32) -> (i32, i32) {
    %c0_i32 = arith.constant 0 : i32
    %c0_i32_0 = arith.constant 0 : i32
    %c0_i32_1 = arith.constant 0 : i32
    return %c0_i32, %c0_i32_0 : i32, i32
  }
  func.func @transform_4(%arg0: i32) -> (i32, i32) {
    %c0_i32 = arith.constant 0 : i32
    %c0_i32_0 = arith.constant 0 : i32
    %c0_i32_1 = arith.constant 0 : i32
    return %c0_i32, %c0_i32_0 : i32, i32
  }
  func.func @transform_5(%arg0: i32) -> (i32, i32) {
    %c0_i32 = arith.constant 0 : i32
    %c0_i32_0 = arith.constant 0 : i32
    %c0_i32_1 = arith.constant 0 : i32
    return %c0_i32, %c0_i32_0 : i32, i32
  }
  func.func @transform_6(%arg0: i32) -> (i32, i32) {
    %c0_i32 = arith.constant 0 : i32
    %c0_i32_0 = arith.constant 0 : i32
    %c0_i32_1 = arith.constant 0 : i32
    return %c0_i32, %c0_i32_0 : i32, i32
  }
  func.func @transform_7(%arg0: i32) -> (i32, i32) {
    %c0_i32 = arith.constant 0 : i32
    %c0_i32_0 = arith.constant 0 : i32
    %c0_i32_1 = arith.constant 0 : i32
    return %c0_i32, %c0_i32_0 : i32, i32
  }
  func.func @transform_8(%arg0: i32) -> (i32, i32) {
    %c0_i32 = arith.constant 0 : i32
    %c0_i32_0 = arith.constant 0 : i32
    %c0_i32_1 = arith.constant 0 : i32
    return %c0_i32, %c0_i32_0 : i32, i32
  }
  func.func @transform_9(%arg0: i32) -> (i32, i32) {
    %c0_i32 = arith.constant 0 : i32
    %c0_i32_0 = arith.constant 0 : i32
    return %arg0, %c0_i32 : i32, i32
  }
}

</mosaic_0001>

<bundles_post_ra>
// kernel: tpu_custom_call.1
= control target key start
LH: loop header
LB: loop body
LE: loop exit
PB: predicated region body
PF: predicated region fallthrough
CT: control target
= control target key end

     0   :  { %14 = vsyncpa [#allocation3], 0  ;;  %s1170_s0 = inlined_call_operand.hbm [shape: bf16[16,256], index: 0, kind: input, shape index: {}]   ;;  %s1171_s1 = inlined_call_operand.hbm [shape: bf16[256,128], index: 1, kind: input, shape index: {}]   ;;  %s1172_s2 = inlined_call_operand.vmem [shape: f32[1,128], index: 2, kind: input, shape index: {}]   ;;  %s1173_s3 = inlined_call_operand.hbm [shape: bf16[128,128], index: 3, kind: input, shape index: {}]   ;;  %s1174_s4 = inlined_call_operand.hbm [shape: f32[1,128], index: 4, kind: input, shape index: {}]   ;;  %s1175_s5 = inlined_call_operand.hbm [shape: bf16[128,128], index: 5, kind: input, shape index: {}]   ;;  %s1176_s6 = inlined_call_operand.vmem [shape: f32[1,128], index: 6, kind: input, shape index: {}]   ;;  %s1177_s7 = inlined_call_operand.hbm [shape: bf16[128,256], index: 7, kind: input, shape index: {}]   ;;  %s1178_s8 = inlined_call_operand.vmem [shape: f32[1,256], index: 8, kind: input, shape index: {}]   ;;  %s1179_s9 = inlined_call_operand.hbm [shape: f32[16,256], index: 9, kind: output, shape index: {}]  }
   0x1   :  { %15 = vsyncpa [#allocation6], 0 }
   0x2   :  { %16 = vsyncpa [#allocation9], 0 }
   0x3   :  { %17 = vsyncpa [#allocation12], 0  ;;  %s36_s11 = sshll.u32 %s1171_s1, 4  ;;  %s37_s11 = int_to_ptr.hbm [resolvable:$true] %s36_s11 }
   0x4   :  { %18 = vsyncpa [#allocation4], 0  ;;  %s1068_s12 = smov [#allocation5]   ;;  %s65_s16 = sshll.u32 %s1174_s4, 4  ;;  %s66_s16 = int_to_ptr.hbm [resolvable:$true] %s65_s16 }
   0x5   :  { %s38_s13 = sshll.u32 %s1068_s12, 4  ;;  %s1069_s17 = smov 64   ;;  %s39_s13 = int_to_ptr.vmem [resolvable:$true] %s38_s13 }
   0x6   :  { %s1070_s18 = smov 4   ;;  %s1071_s19 = smov [#allocation8]  }
   0x7   :  { %44 = dma.hbm_to_vmem [thread:$0]  %s37_s11, 2048, %s39_s13, [#allocation6], %s1069_s17, %s1069_s17, %s1070_s18  }
   0x8   :  { %s67_s20 = sshll.u32 %s1071_s19, 4  ;;  %s23_s22 = sshll.u32 %s1170_s0, 4  ;;  %s68_s20 = int_to_ptr.vmem [resolvable:$true] %s67_s20  ;;  %s24_s22 = int_to_ptr.hbm [resolvable:$true] %s23_s22 }
   0x9   :  { %70 = dma.hbm_to_vmem [thread:$0]  %s66_s16, 16, %s68_s20, [#allocation9]  }
   0xa   :  { %s1072_s23 = smov [#allocation2]   ;;  %s51_s26 = sshll.u32 %s1173_s3, 4  ;;  %s52_s26 = int_to_ptr.hbm [resolvable:$true] %s51_s26 }
   0xb   :  { %s25_s24 = sshll.u32 %s1072_s23, 4  ;;  %s1073_s27 = smov 128   ;;  %s26_s24 = int_to_ptr.vmem [resolvable:$true] %s25_s24 }
   0xc   :  { %s1074_s28 = smov 8   ;;  %s1075_s29 = smov [#allocation7]  }
   0xd   :  { %31 = dma.hbm_to_vmem [thread:$0]  %s24_s22, 256, %s26_s24, [#allocation3], %s1073_s27, %s1073_s27, %s1074_s28  }
   0xe   :  { %s53_s30 = sshll.u32 %s1075_s29, 4  ;;  %s75_s0 = sshll.u32 %s1175_s5, 4  ;;  %s54_s30 = int_to_ptr.vmem [resolvable:$true] %s53_s30  ;;  %s76_s0 = int_to_ptr.hbm [resolvable:$true] %s75_s0 }
   0xf   :  { %59 = dma.hbm_to_vmem [thread:$0]  %s52_s26, 1024, %s54_s30, [#allocation6], %s1069_s17, %s1069_s17, %s1070_s18  }
  0x10   :  { %s90_s3 = sshll.u32 %s1177_s7, 4  ;;  %s1076_s14 = smov [#allocation10]   ;;  %s91_s3 = int_to_ptr.hbm [resolvable:$true] %s90_s3 }
  0x11   :  { %s77_s15 = sshll.u32 %s1076_s14, 4  ;;  %s1077_s16 = smov [#allocation11]   ;;  %s78_s15 = int_to_ptr.vmem [resolvable:$true] %s77_s15 }
  0x12   :  { %83 = dma.hbm_to_vmem [thread:$0]  %s76_s0, 1024, %s78_s15, [#allocation9], %s1069_s17, %s1069_s17, %s1070_s18  }
  0x13   :  { %s92_s5 = sshll.u32 %s1077_s16, 4  ;;  %s93_s5 = int_to_ptr.vmem [resolvable:$true] %s92_s5 }
  0x14   :  { %98 = dma.hbm_to_vmem [thread:$0]  %s91_s3, 2048, %s93_s5, [#allocation12], %s1073_s27, %s1073_s27, %s1074_s28  }
  0x15   :  { %1058 = dma.done.wait [#allocation3], 256  }
  0x16   :  { %1059 = vsyncadd [#allocation3], 4294967040 }
  0x17   :  { %1060 = dma.done.wait [#allocation6], 3072  }
  0x18   :  { %1061 = vsyncadd [#allocation6], 4294964224 }
  0x19   :  { %1062 = dma.done.wait [#allocation9], 1040  }
  0x1a   :  { %1063 = vsyncadd [#allocation9], 4294966256 }
  0x1b   :  { %1064 = dma.done.wait [#allocation12], 2048  }
  0x1c   :  { %1065 = vsyncadd [#allocation12], 4294965248  ;;  %v833_v0 = vld [vmem:[#allocation5 + $0x38] sm:$0xff]  ;;  %v832_v2 = vld [vmem:[#allocation5 + $0x30] sm:$0xff]  ;;  %s608_s23 = sshll.u32 %s1179_s9, 4  ;;  %s1080_s24 = smov 16   ;;  %s609_s23 = int_to_ptr.hbm [resolvable:$true] %s608_s23 }
  0x1d   :  { %v841_v1 = vld [vmem:[#allocation5 + $0x78] sm:$0xff]  ;;  %269 = vmatpush.bf16.msra.mxu0 %v833_v0  ;;  %v840_v3 = vld [vmem:[#allocation5 + $0x70] sm:$0xff]  ;;  %v831_v4 = vld [vmem:[#allocation5 + $0x28] sm:$0xff] }
  0x1e   :  { %283 = vmatpush.bf16.msra.mxu1 %v841_v1  ;;  %v839_v5 = vld [vmem:[#allocation5 + $0x68] sm:$0xff]  ;;  %v849_v6 = vld [vmem:[#allocation7 + $0x38] sm:$0xff]  ;;  %v848_v7 = vld [vmem:[#allocation7 + $0x30] sm:$0xff] }
  0x1f   :  { %368 = vmatpush.bf16.msra.mxu2 %v849_v6  ;;  %v830_v8 = vld [vmem:[#allocation5 + $0x20] sm:$0xff]  ;;  %v847_v10 = vld [vmem:[#allocation7 + $0x28] sm:$0xff]  ;;  %v829_v11 = vld [vmem:[#allocation5 + $0x18] sm:$0xff] }
  0x20   :  { %v838_v9 = vld [vmem:[#allocation5 + $0x60] sm:$0xff]  ;;  %v837_v12 = vld [vmem:[#allocation5 + $0x58] sm:$0xff]  ;;  %v828_v14 = vld [vmem:[#allocation5 + $0x10] sm:$0xff] }
  0x21   :  { %270 = vmatpush.bf16.msra.mxu0 %v832_v2  ;;  %v846_v13 = vld [vmem:[#allocation7 + $0x20] sm:$0xff]  ;;  %v836_v15 = vld [vmem:[#allocation5 + $0x50] sm:$0xff]  ;;  %v827_v16 = vld [vmem:[#allocation5 + $0x8] sm:$0xff] }
  0x22   :  { %284 = vmatpush.bf16.msra.mxu1 %v840_v3  ;;  %v835_v17 = vld [vmem:[#allocation5 + $0x48] sm:$0xff]  ;;  %v826_v18 = vld [vmem:[#allocation5] sm:$0xff]  ;;  %v626_v20 = vld [vmem:[#allocation2] sm:$0xf] }
  0x23   :  { %369 = vmatpush.bf16.msra.mxu2 %v848_v7  ;;  %v834_v19 = vld [vmem:[#allocation5 + $0x40] sm:$0xff]  ;;  %v825_v21 = vld [vmem:[#allocation2 + $0x4] sm:$0xf0]  ;;  %v824_v22 = vld [vmem:[#allocation2 + $0x4] sm:$0xf] }
  0x24   :  { %v628_v23 = vld [vmem:[#allocation2 + $0x8] sm:$0xf0]  ;;  %v627_v24 = vor.u32 %v825_v21, %v626_v20  ;;  %v844_v27 = vld [vmem:[#allocation7 + $0x10] sm:$0xff]  ;;  %v843_v28 = vld [vmem:[#allocation7 + $0x8] sm:$0xff] }
  0x25   :  { %271 = vmatpush.bf16.msra.mxu0 %v831_v4  ;;  %v631_v25 = vor.u32 %v824_v22, %v628_v23  ;;  %v845_v26 = vld [vmem:[#allocation7 + $0x18] sm:$0xff]  ;;  %v842_v29 = vld [vmem:[#allocation7] sm:$0xff]  ;;  %v855_v32 = vld [vmem:[#allocation10 + $0x28] sm:$0xff] }
  0x26   :  { %285 = vmatpush.bf16.msra.mxu1 %v839_v5  ;;  %v857_v30 = vld [vmem:[#allocation10 + $0x38] sm:$0xff]  ;;  %v856_v31 = vld [vmem:[#allocation10 + $0x30] sm:$0xff]  ;;  %v854_v33 = vld [vmem:[#allocation10 + $0x20] sm:$0xff] }
  0x27   :  { %370 = vmatpush.bf16.msra.mxu2 %v847_v10  ;;  %451 = vmatpush.bf16.msra.mxu3 %v857_v30  ;;  %v853_v34 = vld [vmem:[#allocation10 + $0x18] sm:$0xff]  ;;  %v887_v37 = vld [vmem:[%s1172_s2] ss:$0 sm:$0xff]  ;;  %v852_v47 = vld [vmem:[#allocation10 + $0x10] sm:$0xff] }
  0x28   :  { %v851_v48 = vld [vmem:[#allocation10 + $0x8] sm:$0xff]  ;;  %v850_v49 = vld [vmem:[#allocation10] sm:$0xff]  ;;  %v818_v50 = vld [vmem:[#allocation11 + $0x70] sm:$0xf] }
  0x29   :  { %272 = vmatpush.bf16.msra.mxu0 %v830_v8  ;;  %v873_v51 = vld [vmem:[#allocation11 + $0x74] sm:$0xf0]  ;;  %v872_v52 = vld [vmem:[#allocation11 + $0x74] sm:$0xf]  ;;  %v820_v54 = vld [vmem:[#allocation11 + $0x78] sm:$0xf0] }
  0x2a   :  { %286 = vmatpush.bf16.msra.mxu1 %v838_v9  ;;  %v819_v53 = vor.u32 %v873_v51, %v818_v50  ;;  %v810_v55 = vld [vmem:[#allocation11 + $0x60] sm:$0xf]  ;;  %v871_v56 = vld [vmem:[#allocation11 + $0x64] sm:$0xf0]  ;;  %v823_v57 = vor.u32 %v872_v52, %v820_v54  ;;  %v870_v58 = vld [vmem:[#allocation11 + $0x64] sm:$0xf] }
  0x2b   :  { %371 = vmatpush.bf16.msra.mxu2 %v846_v13  ;;  %452 = vmatpush.bf16.msra.mxu3 %v856_v31  ;;  %v812_v59 = vld [vmem:[#allocation11 + $0x68] sm:$0xf0]  ;;  %v811_v60 = vor.u32 %v871_v56, %v810_v55  ;;  %v802_v62 = vld [vmem:[#allocation11 + $0x50] sm:$0xf]  ;;  %v869_v63 = vld [vmem:[#allocation11 + $0x54] sm:$0xf0] }
  0x2c   :  { %v815_v61 = vor.u32 %v870_v58, %v812_v59  ;;  %v868_v0 = vld [vmem:[#allocation11 + $0x54] sm:$0xf]  ;;  %v804_v1 = vld [vmem:[#allocation11 + $0x58] sm:$0xf0]  ;;  %v803_v2 = vor.u32 %v869_v63, %v802_v62  ;;  %v794_v4 = vld [vmem:[#allocation11 + $0x40] sm:$0xf] }
  0x2d   :  { %273 = vmatpush.bf16.msra.mxu0 %v829_v11  ;;  %v807_v3 = vor.u32 %v868_v0, %v804_v1  ;;  %v867_v5 = vld [vmem:[#allocation11 + $0x44] sm:$0xf0]  ;;  %v866_v6 = vld [vmem:[#allocation11 + $0x44] sm:$0xf]  ;;  %v796_v7 = vld [vmem:[#allocation11 + $0x48] sm:$0xf0] }
  0x2e   :  { %287 = vmatpush.bf16.msra.mxu1 %v837_v12  ;;  %v795_v8 = vor.u32 %v867_v5, %v794_v4  ;;  %v799_v9 = vor.u32 %v866_v6, %v796_v7  ;;  %v888_v11 = vld [vmem:[#allocation8] ss:$0 sm:$0xff]  ;;  %v778_v22 = vld [vmem:[#allocation11 + $0x20] sm:$0xf]  ;;  %v863_v23 = vld [vmem:[#allocation11 + $0x24] sm:$0xf0] }
  0x2f   :  { %372 = vmatpush.bf16.msra.mxu2 %v845_v26  ;;  %453 = vmatpush.bf16.msra.mxu3 %v855_v32  ;;  %v788_v20 = vld [vmem:[#allocation11 + $0x38] sm:$0xf0]  ;;  %v780_v26 = vld [vmem:[#allocation11 + $0x28] sm:$0xf0]  ;;  %v860_v30 = vld [vmem:[#allocation11 + $0x14] sm:$0xf] }
  0x30   :  { %v772_v32 = vld [vmem:[#allocation11 + $0x18] sm:$0xf0] }
  0x31   :  { %274 = vmatpush.bf16.msra.mxu0 %v828_v14 }
  0x32   :  { %288 = vmatpush.bf16.msra.mxu1 %v836_v15 }
  0x33   :  { %373 = vmatpush.bf16.msra.mxu2 %v844_v27  ;;  %454 = vmatpush.bf16.msra.mxu3 %v854_v33  ;;  %v775_v33 = vor.u32 %v860_v30, %v772_v32 }
  0x35   :  { %275 = vmatpush.bf16.msra.mxu0 %v827_v16  ;;  %v786_v16 = vld [vmem:[#allocation11 + $0x30] sm:$0xf] }
  0x36   :  { %289 = vmatpush.bf16.msra.mxu1 %v835_v17  ;;  %v865_v17 = vld [vmem:[#allocation11 + $0x34] sm:$0xf0] }
  0x37   :  { %374 = vmatpush.bf16.msra.mxu2 %v843_v28  ;;  %455 = vmatpush.bf16.msra.mxu3 %v853_v34  ;;  %v770_v28 = vld [vmem:[#allocation11 + $0x10] sm:$0xf]  ;;  %v762_v34 = vld [vmem:[#allocation11] sm:$0xf] }
  0x39   :  { %276 = vmatpush.bf16.msra.mxu0 %v826_v18  ;;  %v864_v18 = vld [vmem:[#allocation11 + $0x34] sm:$0xf] }
  0x3a   :  { %290 = vmatpush.bf16.msra.mxu1 %v834_v19  ;;  %v787_v19 = vor.u32 %v865_v17, %v786_v16  ;;  %v791_v21 = vor.u32 %v864_v18, %v788_v20 }
  0x3b   :  { %375 = vmatpush.bf16.msra.mxu2 %v842_v29  ;;  %456 = vmatpush.bf16.msra.mxu3 %v852_v47  ;;  %v861_v29 = vld [vmem:[#allocation11 + $0x14] sm:$0xf0] }
  0x3c   :  { %277 = vmatmul.bf16.vlgmr.msra.gmra.mxu0 %v627_v24  ;;  %v862_v24 = vld [vmem:[#allocation11 + $0x24] sm:$0xf]  ;;  %v771_v31 = vor.u32 %v861_v29, %v770_v28 }
  0x3d   :  { %291 = vmatmul.bf16.vlgmr.msra.gmra.mxu1 %v631_v25  ;;  %570 = vmatpush.bf16.msrb.mxu0 %v819_v53  ;;  %v779_v25 = vor.u32 %v863_v23, %v778_v22  ;;  %v783_v27 = vor.u32 %v862_v24, %v780_v26 }
  0x3e   :  { %584 = vmatpush.bf16.msrb.mxu1 %v823_v57 }
  0x3f   :  { %457 = vmatpush.bf16.msra.mxu3 %v851_v48  ;;  %v484_v48 = vld [vmem:[%s1178_s8] sm:$0x3]  ;;  %s1079_s8 = smov 256  }
  0x40   :  { %v487_v50 = vperm.slane %v484_v48, 1 }
  0x41   :  { %571 = vmatpush.bf16.msrb.mxu0 %v811_v60 }
  0x42   :  { %585 = vmatpush.bf16.msrb.mxu1 %v815_v61 }
  0x43   :  { %458 = vmatpush.bf16.msra.mxu3 %v850_v49  ;;  %v486_v49 = vperm.slane %v484_v48, 0 }
  0x45   :  { %572 = vmatpush.bf16.msrb.mxu0 %v803_v2 }
  0x46   :  { %586 = vmatpush.bf16.msrb.mxu1 %v807_v3 }
  0x49   :  { %573 = vmatpush.bf16.msrb.mxu0 %v795_v8 }
  0x4a   :  { %587 = vmatpush.bf16.msrb.mxu1 %v799_v9 }
  0x4d   :  { %574 = vmatpush.bf16.msrb.mxu0 %v787_v19 }
  0x4e   :  { %588 = vmatpush.bf16.msrb.mxu1 %v791_v21 }
  0x51   :  { %575 = vmatpush.bf16.msrb.mxu0 %v779_v25 }
  0x52   :  { %589 = vmatpush.bf16.msrb.mxu1 %v783_v27 }
  0x55   :  { %576 = vmatpush.bf16.msrb.mxu0 %v771_v31 }
  0x56   :  { %590 = vmatpush.bf16.msrb.mxu1 %v775_v33 }
  0xb9   :  { %v278_v35 = vpop.f32.mrf.mxu0 }
  0xba   :  { %v292_v36 = vpop.f32.mrf.mxu1  ;;  %v279_v38 = vadd.f32 %v887_v37, %v278_v35  ;;  %v859_v35 = vld [vmem:[#allocation11 + $0x4] sm:$0xf0] }
  0xbc   :  { %v293_v40 = vadd.f32 %v292_v36, %v279_v38  ;;  %v858_v36 = vld [vmem:[#allocation11 + $0x4] sm:$0xf]  ;;  %v764_v38 = vld [vmem:[#allocation11 + $0x8] sm:$0xf0] }
  0xbe   :  { %v297_v44 = vmax.f32 %v293_v40, 0.0 }
  0xc1   :  { %v280_v39 = vpop.f32.mrf.mxu0 }
  0xc2   :  { %v281_v41 = vadd.f32 %v887_v37, %v280_v39  ;;  %v294_v42 = vpop.f32.mrf.mxu1  ;;  %v763_v37 = vor.u32 %v859_v35, %v762_v34  ;;  %v767_v39 = vor.u32 %v858_v36, %v764_v38 }
  0xc4   :  { %v295_v43 = vadd.f32 %v294_v42, %v281_v41  ;;  %577 = vmatpush.bf16.msrb.mxu0 %v763_v37  ;;  %591 = vmatpush.bf16.msrb.mxu1 %v767_v39  ;;  %v889_v41 = vld [vmem:[%s1176_s6] ss:$0 sm:$0xff]  ;;  %s1078_s6 = smov [#allocation13]  }
  0xc5   :  { %s606_s21 = sshll.u32 %s1078_s6, 4  ;;  %s607_s21 = int_to_ptr.vmem [resolvable:$true] %s606_s21 }
  0xc6   :  { %v298_v45 = vmax.f32 %v295_v43, 0.0 }
  0xc8   :  { %v299_v46 = vpack.c.bf16 %v298_v45, %v297_v44 }
  0xca   :  { %376 = vmatmul.bf16.vlgmr.msra.gmra.mxu2 %v299_v46 }
 0x14d   :  { %v377_v10 = vpop.f32.mrf.mxu2 }
 0x14e   :  { %v378_v13 = vadd.f32 %v888_v11, %v377_v10 }
 0x155   :  { %v379_v12 = vpop.f32.mrf.mxu2 }
 0x156   :  { %v380_v14 = vadd.f32 %v888_v11, %v379_v12 }
 0x158   :  { %v382_v15 = vpack.c.bf16 %v380_v14, %v378_v13 }
 0x15a   :  { %459 = vmatmul.bf16.vlgmr.msra.gmra.mxu3 %v382_v15 }
 0x1dd   :  { %v460_v40 = vpop.f32.mrf.mxu3 }
 0x1de   :  { %v461_v42 = vadd.f32 %v889_v41, %v460_v40 }
 0x1e0   :  { %v465_v45 = vmax.f32 %v461_v42, 0.0 }
 0x1e5   :  { %v462_v43 = vpop.f32.mrf.mxu3 }
 0x1e6   :  { %v463_v44 = vadd.f32 %v889_v41, %v462_v43 }
 0x1e8   :  { %v466_v46 = vmax.f32 %v463_v44, 0.0 }
 0x1ea   :  { %v467_v47 = vpack.c.bf16 %v466_v46, %v465_v45 }
 0x1ec   :  { %578 = vmatmul.bf16.vlgmr.msrb.gmra.mxu0 %v467_v47  ;;  %592 = vmatmul.bf16.vlgmr.msrb.gmra.mxu1 %v467_v47 }
 0x269   :  { %v579_v51 = vpop.f32.mrf.mxu0  ;;  %v593_v52 = vpop.f32.mrf.mxu1 }
 0x26a   :  { %v580_v53 = vadd.f32 %v579_v51, %v486_v49  ;;  %v594_v54 = vadd.f32 %v593_v52, %v487_v50 }
 0x26c   :  { %598 = vst [vmem:[#allocation13] sm:$0xff] %v580_v53 }
 0x26d   :  { %599 = vst [vmem:[#allocation13 + $0x8] sm:$0xff] %v594_v54 }
 0x271   :  { %v581_v55 = vpop.f32.mrf.mxu0  ;;  %v595_v56 = vpop.f32.mrf.mxu1 }
 0x272   :  { %v582_v57 = vadd.f32 %v581_v55, %v486_v49  ;;  %v596_v58 = vadd.f32 %v595_v56, %v487_v50 }
 0x274   :  { %600 = vst [vmem:[#allocation13 + $0x10] sm:$0xff] %v582_v57 }
 0x275   :  { %601 = vst [vmem:[#allocation13 + $0x18] sm:$0xff] %v596_v58 }
 0x276   :  { %614 = dma.vmem_to_hbm [thread:$0]  %s607_s21, 512, %s609_s23, [#allocation4], %s1079_s8, %s1079_s8, %s1080_s24  }
 0x277   :  { %1066 = dma.done.wait [#allocation4], 512  }
 0x278   :  { %1067 = vsyncadd [#allocation4], 4294966784 }
 0x279   :  { %619 = vsyncpa [#allocation3], 1 }
 0x27a   :  { %620 = vsyncpa [#allocation6], 1 }
 0x27b   :  { %621 = vsyncpa [#allocation9], 1 }
 0x27c   :  { %622 = vsyncpa [#allocation12], 1 }
 0x27d   :  { %623 = vsyncpa [#allocation4], 1 }

// kernel: tpu_custom_call.1
= control target key start
LH: loop header
LB: loop body
LE: loop exit
PB: predicated region body
PF: predicated region fallthrough
CT: control target
= control target key end

     0   :  { %14 = vsyncpa [#allocation3], 0  ;;  %s1170_s0 = inlined_call_operand.hbm [shape: bf16[16,256], index: 0, kind: input, shape index: {}]   ;;  %s1171_s1 = inlined_call_operand.hbm [shape: bf16[256,128], index: 1, kind: input, shape index: {}]   ;;  %s1172_s2 = inlined_call_operand.vmem [shape: f32[1,128], index: 2, kind: input, shape index: {}]   ;;  %s1173_s3 = inlined_call_operand.hbm [shape: bf16[128,128], index: 3, kind: input, shape index: {}]   ;;  %s1174_s4 = inlined_call_operand.hbm [shape: f32[1,128], index: 4, kind: input, shape index: {}]   ;;  %s1175_s5 = inlined_call_operand.hbm [shape: bf16[128,128], index: 5, kind: input, shape index: {}]   ;;  %s1176_s6 = inlined_call_operand.vmem [shape: f32[1,128], index: 6, kind: input, shape index: {}]   ;;  %s1177_s7 = inlined_call_operand.hbm [shape: bf16[128,256], index: 7, kind: input, shape index: {}]   ;;  %s1178_s8 = inlined_call_operand.vmem [shape: f32[1,256], index: 8, kind: input, shape index: {}]   ;;  %s1179_s9 = inlined_call_operand.hbm [shape: f32[16,256], index: 9, kind: output, shape index: {}]  }
   0x1   :  { %15 = vsyncpa [#allocation6], 0 }
   0x2   :  { %16 = vsyncpa [#allocation9], 0 }
   0x3   :  { %17 = vsyncpa [#allocation12], 0  ;;  %s36_s11 = sshll.u32 %s1171_s1, 4  ;;  %s37_s11 = int_to_ptr.hbm [resolvable:$true] %s36_s11 }
   0x4   :  { %18 = vsyncpa [#allocation4], 0  ;;  %s1068_s12 = smov [#allocation5]   ;;  %s65_s16 = sshll.u32 %s1174_s4, 4  ;;  %s66_s16 = int_to_ptr.hbm [resolvable:$true] %s65_s16 }
   0x5   :  { %s38_s13 = sshll.u32 %s1068_s12, 4  ;;  %s1069_s17 = smov 64   ;;  %s39_s13 = int_to_ptr.vmem [resolvable:$true] %s38_s13 }
   0x6   :  { %s1070_s18 = smov 4   ;;  %s1071_s19 = smov [#allocation8]  }
   0x7   :  { %44 = dma.hbm_to_vmem [thread:$0]  %s37_s11, 2048, %s39_s13, [#allocation6], %s1069_s17, %s1069_s17, %s1070_s18  }
   0x8   :  { %s67_s20 = sshll.u32 %s1071_s19, 4  ;;  %s23_s22 = sshll.u32 %s1170_s0, 4  ;;  %s68_s20 = int_to_ptr.vmem [resolvable:$true] %s67_s20  ;;  %s24_s22 = int_to_ptr.hbm [resolvable:$true] %s23_s22 }
   0x9   :  { %70 = dma.hbm_to_vmem [thread:$0]  %s66_s16, 16, %s68_s20, [#allocation9]  }
   0xa   :  { %s1072_s23 = smov [#allocation2]   ;;  %s51_s26 = sshll.u32 %s1173_s3, 4  ;;  %s52_s26 = int_to_ptr.hbm [resolvable:$true] %s51_s26 }
   0xb   :  { %s25_s24 = sshll.u32 %s1072_s23, 4  ;;  %s1073_s27 = smov 128   ;;  %s26_s24 = int_to_ptr.vmem [resolvable:$true] %s25_s24 }
   0xc   :  { %s1074_s28 = smov 8   ;;  %s1075_s29 = smov [#allocation7]  }
   0xd   :  { %31 = dma.hbm_to_vmem [thread:$0]  %s24_s22, 256, %s26_s24, [#allocation3], %s1073_s27, %s1073_s27, %s1074_s28  }
   0xe   :  { %s53_s30 = sshll.u32 %s1075_s29, 4  ;;  %s75_s0 = sshll.u32 %s1175_s5, 4  ;;  %s54_s30 = int_to_ptr.vmem [resolvable:$true] %s53_s30  ;;  %s76_s0 = int_to_ptr.hbm [resolvable:$true] %s75_s0 }
   0xf   :  { %59 = dma.hbm_to_vmem [thread:$0]  %s52_s26, 1024, %s54_s30, [#allocation6], %s1069_s17, %s1069_s17, %s1070_s18  }
  0x10   :  { %s90_s3 = sshll.u32 %s1177_s7, 4  ;;  %s1076_s14 = smov [#allocation10]   ;;  %s91_s3 = int_to_ptr.hbm [resolvable:$true] %s90_s3 }
  0x11   :  { %s77_s15 = sshll.u32 %s1076_s14, 4  ;;  %s1077_s16 = smov [#allocation11]   ;;  %s78_s15 = int_to_ptr.vmem [resolvable:$true] %s77_s15 }
  0x12   :  { %83 = dma.hbm_to_vmem [thread:$0]  %s76_s0, 1024, %s78_s15, [#allocation9], %s1069_s17, %s1069_s17, %s1070_s18  }
  0x13   :  { %s92_s5 = sshll.u32 %s1077_s16, 4  ;;  %s93_s5 = int_to_ptr.vmem [resolvable:$true] %s92_s5 }
  0x14   :  { %98 = dma.hbm_to_vmem [thread:$0]  %s91_s3, 2048, %s93_s5, [#allocation12], %s1073_s27, %s1073_s27, %s1074_s28  }
  0x15   :  { %1058 = dma.done.wait [#allocation3], 256  }
  0x16   :  { %1059 = vsyncadd [#allocation3], 4294967040 }
  0x17   :  { %1060 = dma.done.wait [#allocation6], 3072  }
  0x18   :  { %1061 = vsyncadd [#allocation6], 4294964224 }
  0x19   :  { %1062 = dma.done.wait [#allocation9], 1040  }
  0x1a   :  { %1063 = vsyncadd [#allocation9], 4294966256 }
  0x1b   :  { %1064 = dma.done.wait [#allocation12], 2048  }
  0x1c   :  { %1065 = vsyncadd [#allocation12], 4294965248  ;;  %v833_v0 = vld [vmem:[#allocation5 + $0x38] sm:$0xff]  ;;  %v832_v2 = vld [vmem:[#allocation5 + $0x30] sm:$0xff]  ;;  %s608_s23 = sshll.u32 %s1179_s9, 4  ;;  %s1080_s24 = smov 16   ;;  %s609_s23 = int_to_ptr.hbm [resolvable:$true] %s608_s23 }
  0x1d   :  { %v841_v1 = vld [vmem:[#allocation5 + $0x78] sm:$0xff]  ;;  %269 = vmatpush.bf16.msra.mxu0 %v833_v0  ;;  %v840_v3 = vld [vmem:[#allocation5 + $0x70] sm:$0xff]  ;;  %v831_v4 = vld [vmem:[#allocation5 + $0x28] sm:$0xff] }
  0x1e   :  { %283 = vmatpush.bf16.msra.mxu1 %v841_v1  ;;  %v839_v5 = vld [vmem:[#allocation5 + $0x68] sm:$0xff]  ;;  %v849_v6 = vld [vmem:[#allocation7 + $0x38] sm:$0xff]  ;;  %v848_v7 = vld [vmem:[#allocation7 + $0x30] sm:$0xff] }
  0x1f   :  { %368 = vmatpush.bf16.msra.mxu2 %v849_v6  ;;  %v830_v8 = vld [vmem:[#allocation5 + $0x20] sm:$0xff]  ;;  %v847_v10 = vld [vmem:[#allocation7 + $0x28] sm:$0xff]  ;;  %v829_v11 = vld [vmem:[#allocation5 + $0x18] sm:$0xff] }
  0x20   :  { %v838_v9 = vld [vmem:[#allocation5 + $0x60] sm:$0xff]  ;;  %v837_v12 = vld [vmem:[#allocation5 + $0x58] sm:$0xff]  ;;  %v828_v14 = vld [vmem:[#allocation5 + $0x10] sm:$0xff] }
  0x21   :  { %270 = vmatpush.bf16.msra.mxu0 %v832_v2  ;;  %v846_v13 = vld [vmem:[#allocation7 + $0x20] sm:$0xff]  ;;  %v836_v15 = vld [vmem:[#allocation5 + $0x50] sm:$0xff]  ;;  %v827_v16 = vld [vmem:[#allocation5 + $0x8] sm:$0xff] }
  0x22   :  { %284 = vmatpush.bf16.msra.mxu1 %v840_v3  ;;  %v835_v17 = vld [vmem:[#allocation5 + $0x48] sm:$0xff]  ;;  %v826_v18 = vld [vmem:[#allocation5] sm:$0xff]  ;;  %v626_v20 = vld [vmem:[#allocation2] sm:$0xf] }
  0x23   :  { %369 = vmatpush.bf16.msra.mxu2 %v848_v7  ;;  %v834_v19 = vld [vmem:[#allocation5 + $0x40] sm:$0xff]  ;;  %v825_v21 = vld [vmem:[#allocation2 + $0x4] sm:$0xf0]  ;;  %v824_v22 = vld [vmem:[#allocation2 + $0x4] sm:$0xf] }
  0x24   :  { %v628_v23 = vld [vmem:[#allocation2 + $0x8] sm:$0xf0]  ;;  %v627_v24 = vor.u32 %v825_v21, %v626_v20  ;;  %v844_v27 = vld [vmem:[#allocation7 + $0x10] sm:$0xff]  ;;  %v843_v28 = vld [vmem:[#allocation7 + $0x8] sm:$0xff] }
  0x25   :  { %271 = vmatpush.bf16.msra.mxu0 %v831_v4  ;;  %v631_v25 = vor.u32 %v824_v22, %v628_v23  ;;  %v845_v26 = vld [vmem:[#allocation7 + $0x18] sm:$0xff]  ;;  %v842_v29 = vld [vmem:[#allocation7] sm:$0xff]  ;;  %v855_v32 = vld [vmem:[#allocation10 + $0x28] sm:$0xff] }
  0x26   :  { %285 = vmatpush.bf16.msra.mxu1 %v839_v5  ;;  %v857_v30 = vld [vmem:[#allocation10 + $0x38] sm:$0xff]  ;;  %v856_v31 = vld [vmem:[#allocation10 + $0x30] sm:$0xff]  ;;  %v854_v33 = vld [vmem:[#allocation10 + $0x20] sm:$0xff] }
  0x27   :  { %370 = vmatpush.bf16.msra.mxu2 %v847_v10  ;;  %451 = vmatpush.bf16.msra.mxu3 %v857_v30  ;;  %v853_v34 = vld [vmem:[#allocation10 + $0x18] sm:$0xff]  ;;  %v887_v37 = vld [vmem:[%s1172_s2] ss:$0 sm:$0xff]  ;;  %v852_v47 = vld [vmem:[#allocation10 + $0x10] sm:$0xff] }
  0x28   :  { %v851_v48 = vld [vmem:[#allocation10 + $0x8] sm:$0xff]  ;;  %v850_v49 = vld [vmem:[#allocation10] sm:$0xff]  ;;  %v818_v50 = vld [vmem:[#allocation11 + $0x70] sm:$0xf] }
  0x29   :  { %272 = vmatpush.bf16.msra.mxu0 %v830_v8  ;;  %v873_v51 = vld [vmem:[#allocation11 + $0x74] sm:$0xf0]  ;;  %v872_v52 = vld [vmem:[#allocation11 + $0x74] sm:$0xf]  ;;  %v820_v54 = vld [vmem:[#allocation11 + $0x78] sm:$0xf0] }
  0x2a   :  { %286 = vmatpush.bf16.msra.mxu1 %v838_v9  ;;  %v819_v53 = vor.u32 %v873_v51, %v818_v50  ;;  %v810_v55 = vld [vmem:[#allocation11 + $0x60] sm:$0xf]  ;;  %v871_v56 = vld [vmem:[#allocation11 + $0x64] sm:$0xf0]  ;;  %v823_v57 = vor.u32 %v872_v52, %v820_v54  ;;  %v870_v58 = vld [vmem:[#allocation11 + $0x64] sm:$0xf] }
  0x2b   :  { %371 = vmatpush.bf16.msra.mxu2 %v846_v13  ;;  %452 = vmatpush.bf16.msra.mxu3 %v856_v31  ;;  %v812_v59 = vld [vmem:[#allocation11 + $0x68] sm:$0xf0]  ;;  %v811_v60 = vor.u32 %v871_v56, %v810_v55  ;;  %v802_v62 = vld [vmem:[#allocation11 + $0x50] sm:$0xf]  ;;  %v869_v63 = vld [vmem:[#allocation11 + $0x54] sm:$0xf0] }
  0x2c   :  { %v815_v61 = vor.u32 %v870_v58, %v812_v59  ;;  %v868_v0 = vld [vmem:[#allocation11 + $0x54] sm:$0xf]  ;;  %v804_v1 = vld [vmem:[#allocation11 + $0x58] sm:$0xf0]  ;;  %v803_v2 = vor.u32 %v869_v63, %v802_v62  ;;  %v794_v4 = vld [vmem:[#allocation11 + $0x40] sm:$0xf] }
  0x2d   :  { %273 = vmatpush.bf16.msra.mxu0 %v829_v11  ;;  %v807_v3 = vor.u32 %v868_v0, %v804_v1  ;;  %v867_v5 = vld [vmem:[#allocation11 + $0x44] sm:$0xf0]  ;;  %v866_v6 = vld [vmem:[#allocation11 + $0x44] sm:$0xf]  ;;  %v796_v7 = vld [vmem:[#allocation11 + $0x48] sm:$0xf0] }
  0x2e   :  { %287 = vmatpush.bf16.msra.mxu1 %v837_v12  ;;  %v795_v8 = vor.u32 %v867_v5, %v794_v4  ;;  %v799_v9 = vor.u32 %v866_v6, %v796_v7  ;;  %v888_v11 = vld [vmem:[#allocation8] ss:$0 sm:$0xff]  ;;  %v778_v22 = vld [vmem:[#allocation11 + $0x20] sm:$0xf]  ;;  %v863_v23 = vld [vmem:[#allocation11 + $0x24] sm:$0xf0] }
  0x2f   :  { %372 = vmatpush.bf16.msra.mxu2 %v845_v26  ;;  %453 = vmatpush.bf16.msra.mxu3 %v855_v32  ;;  %v788_v20 = vld [vmem:[#allocation11 + $0x38] sm:$0xf0]  ;;  %v780_v26 = vld [vmem:[#allocation11 + $0x28] sm:$0xf0]  ;;  %v860_v30 = vld [vmem:[#allocation11 + $0x14] sm:$0xf] }
  0x30   :  { %v772_v32 = vld [vmem:[#allocation11 + $0x18] sm:$0xf0] }
  0x31   :  { %274 = vmatpush.bf16.msra.mxu0 %v828_v14 }
  0x32   :  { %288 = vmatpush.bf16.msra.mxu1 %v836_v15 }
  0x33   :  { %373 = vmatpush.bf16.msra.mxu2 %v844_v27  ;;  %454 = vmatpush.bf16.msra.mxu3 %v854_v33  ;;  %v775_v33 = vor.u32 %v860_v30, %v772_v32 }
  0x35   :  { %275 = vmatpush.bf16.msra.mxu0 %v827_v16  ;;  %v786_v16 = vld [vmem:[#allocation11 + $0x30] sm:$0xf] }
  0x36   :  { %289 = vmatpush.bf16.msra.mxu1 %v835_v17  ;;  %v865_v17 = vld [vmem:[#allocation11 + $0x34] sm:$0xf0] }
  0x37   :  { %374 = vmatpush.bf16.msra.mxu2 %v843_v28  ;;  %455 = vmatpush.bf16.msra.mxu3 %v853_v34  ;;  %v770_v28 = vld [vmem:[#allocation11 + $0x10] sm:$0xf]  ;;  %v762_v34 = vld [vmem:[#allocation11] sm:$0xf] }
  0x39   :  { %276 = vmatpush.bf16.msra.mxu0 %v826_v18  ;;  %v864_v18 = vld [vmem:[#allocation11 + $0x34] sm:$0xf] }
  0x3a   :  { %290 = vmatpush.bf16.msra.mxu1 %v834_v19  ;;  %v787_v19 = vor.u32 %v865_v17, %v786_v16  ;;  %v791_v21 = vor.u32 %v864_v18, %v788_v20 }
  0x3b   :  { %375 = vmatpush.bf16.msra.mxu2 %v842_v29  ;;  %456 = vmatpush.bf16.msra.mxu3 %v852_v47  ;;  %v861_v29 = vld [vmem:[#allocation11 + $0x14] sm:$0xf0] }
  0x3c   :  { %277 = vmatmul.bf16.vlgmr.msra.gmra.mxu0 %v627_v24  ;;  %v862_v24 = vld [vmem:[#allocation11 + $0x24] sm:$0xf]  ;;  %v771_v31 = vor.u32 %v861_v29, %v770_v28 }
  0x3d   :  { %291 = vmatmul.bf16.vlgmr.msra.gmra.mxu1 %v631_v25  ;;  %570 = vmatpush.bf16.msrb.mxu0 %v819_v53  ;;  %v779_v25 = vor.u32 %v863_v23, %v778_v22  ;;  %v783_v27 = vor.u32 %v862_v24, %v780_v26 }
  0x3e   :  { %584 = vmatpush.bf16.msrb.mxu1 %v823_v57 }
  0x3f   :  { %457 = vmatpush.bf16.msra.mxu3 %v851_v48  ;;  %v484_v48 = vld [vmem:[%s1178_s8] sm:$0x3]  ;;  %s1079_s8 = smov 256  }
  0x40   :  { %v487_v50 = vperm.slane %v484_v48, 1 }
  0x41   :  { %571 = vmatpush.bf16.msrb.mxu0 %v811_v60 }
  0x42   :  { %585 = vmatpush.bf16.msrb.mxu1 %v815_v61 }
  0x43   :  { %458 = vmatpush.bf16.msra.mxu3 %v850_v49  ;;  %v486_v49 = vperm.slane %v484_v48, 0 }
  0x45   :  { %572 = vmatpush.bf16.msrb.mxu0 %v803_v2 }
  0x46   :  { %586 = vmatpush.bf16.msrb.mxu1 %v807_v3 }
  0x49   :  { %573 = vmatpush.bf16.msrb.mxu0 %v795_v8 }
  0x4a   :  { %587 = vmatpush.bf16.msrb.mxu1 %v799_v9 }
  0x4d   :  { %574 = vmatpush.bf16.msrb.mxu0 %v787_v19 }
  0x4e   :  { %588 = vmatpush.bf16.msrb.mxu1 %v791_v21 }
  0x51   :  { %575 = vmatpush.bf16.msrb.mxu0 %v779_v25 }
  0x52   :  { %589 = vmatpush.bf16.msrb.mxu1 %v783_v27 }
  0x55   :  { %576 = vmatpush.bf16.msrb.mxu0 %v771_v31 }
  0x56   :  { %590 = vmatpush.bf16.msrb.mxu1 %v775_v33 }
  0xb9   :  { %v278_v35 = vpop.f32.mrf.mxu0 }
  0xba   :  { %v292_v36 = vpop.f32.mrf.mxu1  ;;  %v279_v38 = vadd.f32 %v887_v37, %v278_v35  ;;  %v859_v35 = vld [vmem:[#allocation11 + $0x4] sm:$0xf0] }
  0xbc   :  { %v293_v40 = vadd.f32 %v292_v36, %v279_v38  ;;  %v858_v36 = vld [vmem:[#allocation11 + $0x4] sm:$0xf]  ;;  %v764_v38 = vld [vmem:[#allocation11 + $0x8] sm:$0xf0] }
  0xbe   :  { %v297_v44 = vmax.f32 %v293_v40, 0.0 }
  0xc1   :  { %v280_v39 = vpop.f32.mrf.mxu0 }
  0xc2   :  { %v281_v41 = vadd.f32 %v887_v37, %v280_v39  ;;  %v294_v42 = vpop.f32.mrf.mxu1  ;;  %v763_v37 = vor.u32 %v859_v35, %v762_v34  ;;  %v767_v39 = vor.u32 %v858_v36, %v764_v38 }
  0xc4   :  { %v295_v43 = vadd.f32 %v294_v42, %v281_v41  ;;  %577 = vmatpush.bf16.msrb.mxu0 %v763_v37  ;;  %591 = vmatpush.bf16.msrb.mxu1 %v767_v39  ;;  %v889_v41 = vld [vmem:[%s1176_s6] ss:$0 sm:$0xff]  ;;  %s1078_s6 = smov [#allocation13]  }
  0xc5   :  { %s606_s21 = sshll.u32 %s1078_s6, 4  ;;  %s607_s21 = int_to_ptr.vmem [resolvable:$true] %s606_s21 }
  0xc6   :  { %v298_v45 = vmax.f32 %v295_v43, 0.0 }
  0xc8   :  { %v299_v46 = vpack.c.bf16 %v298_v45, %v297_v44 }
  0xca   :  { %376 = vmatmul.bf16.vlgmr.msra.gmra.mxu2 %v299_v46 }
 0x14d   :  { %v377_v10 = vpop.f32.mrf.mxu2 }
 0x14e   :  { %v378_v13 = vadd.f32 %v888_v11, %v377_v10 }
 0x155   :  { %v379_v12 = vpop.f32.mrf.mxu2 }
 0x156   :  { %v380_v14 = vadd.f32 %v888_v11, %v379_v12 }
 0x158   :  { %v382_v15 = vpack.c.bf16 %v380_v14, %v378_v13 }
 0x15a   :  { %459 = vmatmul.bf16.vlgmr.msra.gmra.mxu3 %v382_v15 }
 0x1dd   :  { %v460_v40 = vpop.f32.mrf.mxu3 }
 0x1de   :  { %v461_v42 = vadd.f32 %v889_v41, %v460_v40 }
 0x1e0   :  { %v465_v45 = vmax.f32 %v461_v42, 0.0 }
 0x1e5   :  { %v462_v43 = vpop.f32.mrf.mxu3 }
 0x1e6   :  { %v463_v44 = vadd.f32 %v889_v41, %v462_v43 }
 0x1e8   :  { %v466_v46 = vmax.f32 %v463_v44, 0.0 }
 0x1ea   :  { %v467_v47 = vpack.c.bf16 %v466_v46, %v465_v45 }
 0x1ec   :  { %578 = vmatmul.bf16.vlgmr.msrb.gmra.mxu0 %v467_v47  ;;  %592 = vmatmul.bf16.vlgmr.msrb.gmra.mxu1 %v467_v47 }
 0x269   :  { %v579_v51 = vpop.f32.mrf.mxu0  ;;  %v593_v52 = vpop.f32.mrf.mxu1 }
 0x26a   :  { %v580_v53 = vadd.f32 %v579_v51, %v486_v49  ;;  %v594_v54 = vadd.f32 %v593_v52, %v487_v50 }
 0x26c   :  { %598 = vst [vmem:[#allocation13] sm:$0xff] %v580_v53 }
 0x26d   :  { %599 = vst [vmem:[#allocation13 + $0x8] sm:$0xff] %v594_v54 }
 0x271   :  { %v581_v55 = vpop.f32.mrf.mxu0  ;;  %v595_v56 = vpop.f32.mrf.mxu1 }
 0x272   :  { %v582_v57 = vadd.f32 %v581_v55, %v486_v49  ;;  %v596_v58 = vadd.f32 %v595_v56, %v487_v50 }
 0x274   :  { %600 = vst [vmem:[#allocation13 + $0x10] sm:$0xff] %v582_v57 }
 0x275   :  { %601 = vst [vmem:[#allocation13 + $0x18] sm:$0xff] %v596_v58 }
 0x276   :  { %614 = dma.vmem_to_hbm [thread:$0]  %s607_s21, 512, %s609_s23, [#allocation4], %s1079_s8, %s1079_s8, %s1080_s24  }
 0x277   :  { %1066 = dma.done.wait [#allocation4], 512  }
 0x278   :  { %1067 = vsyncadd [#allocation4], 4294966784 }
 0x279   :  { %619 = vsyncpa [#allocation3], 1 }
 0x27a   :  { %620 = vsyncpa [#allocation6], 1 }
 0x27b   :  { %621 = vsyncpa [#allocation9], 1 }
 0x27c   :  { %622 = vsyncpa [#allocation12], 1 }
 0x27d   :  { %623 = vsyncpa [#allocation4], 1 }

</bundles_post_ra>
